<compile_context>
chip_gen: v6e
topology: v6e:2x2x1
jax: 0.10.0
libtpu: 0.0.40
codegen_flags: <defaults>
</compile_context>

<pallas_src>
import functools

import jax
import jax.numpy as jnp
from jax.experimental import pallas as pl
from jax.experimental.pallas import tpu as pltpu


def _round_up(x, m):
    return (x + m - 1) // m * m


# ----------------------------------------------------------------------------- kernels
def _mm_stats_kernel(x_ref, w_ref, y_ref, stats_ref):
    """One M-tile: y = x @ w (bf16 in, f32 acc) + per-tile per-channel sum / sum-of-squares."""
    y = jnp.dot(x_ref[...], w_ref[...], preferred_element_type=jnp.float32)
    y_ref[...] = y
    n = y.shape[1]
    s1 = jnp.sum(y, axis=0, keepdims=True)        # (1, Np)
    s2 = jnp.sum(y * y, axis=0, keepdims=True)    # (1, Np)
    pad = jnp.zeros((6, n), jnp.float32)
    stats_ref[...] = jnp.concatenate([s1, s2, pad], axis=0)   # (8, Np) slab: rows 0/1 used


def _make_bn_act_kernel(slope, apply_act, has_residual):
    """One M-tile: y*scale + shift (folded BN affine), optional residual add, LeakyReLU."""

    def kernel(*refs):
        if has_residual:
            y_ref, ss_ref, r_ref, o_ref = refs
        else:
            y_ref, ss_ref, o_ref = refs
            r_ref = None
        ss = ss_ref[...]                              # (8, Np): row0 = scale, row1 = shift
        y = y_ref[...] * ss[0:1, :] + ss[1:2, :]      # f32 elementwise (v5e-friendly)
        if r_ref is not None:
            y = y + r_ref[...]
        if apply_act:
            y = jnp.where(y > 0, y, slope * y)
        o_ref[...] = y.astype(o_ref.dtype)

    return kernel


_PARALLEL_1D = pltpu.CompilerParams(dimension_semantics=("parallel",))


# ----------------------------------------------------------------------------- pallas wrappers
def _matmul_stats(x_pad, w_pad, tm):
    """x_pad (Mpad,Kp) bf16, w_pad (Kp,Np) bf16 -> y (Mpad,Np) f32, stats (nmt*8,Np) f32."""
    Mpad, Kp = x_pad.shape
    Np = w_pad.shape[1]
    nmt = Mpad // tm
    return pl.pallas_call(
        _mm_stats_kernel,
        grid=(nmt,),
        in_specs=[
            pl.BlockSpec((tm, Kp), lambda i: (i, 0)),
            pl.BlockSpec((Kp, Np), lambda i: (0, 0)),
        ],
        out_specs=[
            pl.BlockSpec((tm, Np), lambda i: (i, 0)),
            pl.BlockSpec((8, Np), lambda i: (i, 0)),
        ],
        out_shape=[
            jax.ShapeDtypeStruct((Mpad, Np), jnp.float32),
            jax.ShapeDtypeStruct((nmt * 8, Np), jnp.float32),
        ],
        compiler_params=_PARALLEL_1D,
    )(x_pad, w_pad)


def _bn_affine_act(y, ss, residual, *, act, slope, tm, out_dtype):
    Mpad, Np = y.shape
    nmt = Mpad // tm
    inputs = [y, ss]
    in_specs = [
        pl.BlockSpec((tm, Np), lambda i: (i, 0)),
        pl.BlockSpec((8, Np), lambda i: (0, 0)),      # packed scale/shift, one small tile
    ]
    if residual is not None:
        inputs.append(residual)
        in_specs.append(pl.BlockSpec((tm, Np), lambda i: (i, 0)))
    kernel = _make_bn_act_kernel(slope, act, residual is not None)
    return pl.pallas_call(
        kernel,
        grid=(nmt,),
        in_specs=in_specs,
        out_specs=pl.BlockSpec((tm, Np), lambda i: (i, 0)),
        out_shape=jax.ShapeDtypeStruct((Mpad, Np), out_dtype),
        compiler_params=_PARALLEL_1D,
    )(*inputs)


def _conv_bn(x2d, w_pad, gamma_pad, beta_pad, *, M, Mpad, tm, eps, slope,
             act, residual=None, out_dtype=jnp.float32):
    """Conv-as-GEMM + training-mode BatchNorm (+residual, +LeakyReLU), two tiled passes."""
    Kp, Np = w_pad.shape
    K = x2d.shape[1]
    x_pad = (jnp.zeros((Mpad, Kp), jnp.bfloat16)
             .at[:M, :K].set(x2d.astype(jnp.bfloat16)))

    y, stats = _matmul_stats(x_pad, w_pad, tm)

    # Tiny cross-tile reduction of the per-tile partial sums (plain JAX).  Padded rows of
    # x_pad are exactly zero -> contribute nothing; divide by the true M.
    nmt = Mpad // tm
    st = stats.reshape(nmt, 8, Np)
    s1 = jnp.sum(st[:, 0, :], axis=0)
    s2 = jnp.sum(st[:, 1, :], axis=0)
    mean = s1 / M
    # E[y^2]-E[y]^2 with f32 accumulators; clamp guards tiny negative round-off.
    var = jnp.maximum(s2 / M - mean * mean, 0.0)
    scale = gamma_pad * jax.lax.rsqrt(var + eps)
    shift = beta_pad - mean * scale                 # conv bias cancelled by BN -> dropped
    ss = jnp.zeros((8, Np), jnp.float32).at[0].set(scale).at[1].set(shift)

    return _bn_affine_act(y, ss, residual, act=act, slope=slope, tm=tm, out_dtype=out_dtype)


# ----------------------------------------------------------------------------- glue
def _im2col(x_nhwc, ksize, stride, pad):
    """Extract (k x k) patches -> (B*Ho*Wo, k*k*C), row order (dy, dx, cin)."""
    B, H, W, C = x_nhwc.shape
    xp = jnp.pad(x_nhwc, ((0, 0), (pad, pad), (pad, pad), (0, 0)))
    Ho = (H + 2 * pad - ksize) // stride + 1
    Wo = (W + 2 * pad - ksize) // stride + 1
    patches = []
    for dy in range(ksize):
        for dx in range(ksize):
            patches.append(
                xp[:, dy:dy + Ho * stride:stride, dx:dx + Wo * stride:stride, :])
    p = jnp.concatenate(patches, axis=-1)
    return p.reshape(B * Ho * Wo, ksize * ksize * C), Ho, Wo


def _choose_tm(M, block_m=None):
    if block_m is None:
        block_m = 512   # 256-multiple for the 2x256x256 MXU on v6e/v7x; fits v7x VMEM easily
    tm = min(block_m, _round_up(M, 8))
    tm = _round_up(tm, 8)
    nmt = -(-M // tm)
    return tm, nmt * tm


def init_resblock_params(key, in_channels, out_channels):
    ks = jax.random.split(key, 10)
    return {
        "w1": jax.random.normal(ks[0], (out_channels, in_channels, 3, 3), jnp.float32) * 0.1,
        "b1": jax.random.normal(ks[1], (out_channels,), jnp.float32) * 0.1,
        "g1": 1.0 + 0.1 * jax.random.normal(ks[2], (out_channels,), jnp.float32),
        "bt1": 0.1 * jax.random.normal(ks[3], (out_channels,), jnp.float32),
        "w2": jax.random.normal(ks[4], (out_channels, out_channels, 3, 3), jnp.float32) * 0.1,
        "b2": jax.random.normal(ks[5], (out_channels,), jnp.float32) * 0.1,
        "g2": 1.0 + 0.1 * jax.random.normal(ks[6], (out_channels,), jnp.float32),
        "bt2": 0.1 * jax.random.normal(ks[7], (out_channels,), jnp.float32),
        "ws": jax.random.normal(ks[8], (out_channels, in_channels, 1, 1), jnp.float32) * 0.1,
        "gs": 1.0 + 0.1 * jax.random.normal(ks[9], (out_channels,), jnp.float32),
        "bts": jnp.zeros((out_channels,), jnp.float32),
    }


def prepare_resblock_params(params):
    """One-time layout prep: OIHW -> (K, Cout) matrix, pad to (Kp, Np), cast weights to bf16.
    Conv biases b1/b2 are intentionally dropped (exactly cancelled by training-mode BN)."""
    Cout, Cin = params["w1"].shape[0], params["w1"].shape[1]
    Np = _round_up(Cout, 128)

    def prep_w(w_oihw):
        w2d = jnp.transpose(w_oihw, (2, 3, 1, 0)).reshape(-1, w_oihw.shape[0])
        Kp = _round_up(w2d.shape[0], 128)
        return (jnp.zeros((Kp, Np), jnp.bfloat16)
                .at[:w2d.shape[0], :Cout].set(w2d.astype(jnp.bfloat16)))

    def prep_v(v):
        return jnp.zeros((Np,), jnp.float32).at[:Cout].set(v)

    return {
        "cout": Cout, "cin": Cin, "npad": Np,
        "w1": prep_w(params["w1"]), "g1": prep_v(params["g1"]), "bt1": prep_v(params["bt1"]),
        "w2": prep_w(params["w2"]), "g2": prep_v(params["g2"]), "bt2": prep_v(params["bt2"]),
        "ws": prep_w(params["ws"]), "gs": prep_v(params["gs"]), "bts": prep_v(params["bts"]),
    }


def resblock_forward(x_nchw, prep, *, stride=1, eps=1e-5, slope=0.1, block_m=None):
    """Pallas-backed ResBlock forward (modules=1). Input/output are NCHW like PyTorch."""
    x = jnp.transpose(x_nchw, (0, 2, 3, 1)).astype(jnp.float32)   # NCHW -> NHWC
    B, H, W, Cin = x.shape
    Cout, Np = prep["cout"], prep["npad"]

    # --- conv1: 3x3, stride, pad=1 + BN + LeakyReLU
    p1, Ho, Wo = _im2col(x, 3, stride, 1)
    M = B * Ho * Wo
    tm, Mpad = _choose_tm(M, block_m)
    h1 = _conv_bn(p1, prep["w1"], prep["g1"], prep["bt1"], M=M, Mpad=Mpad, tm=tm,
                  eps=eps, slope=slope, act=True, out_dtype=jnp.bfloat16)
    h1_img = h1[:M, :Cout].reshape(B, Ho, Wo, Cout)    # bf16: only feeds the next bf16 GEMM

    # --- shortcut: 1x1 conv (stride, bias=False) + BN, or identity
    if stride != 1 or Cin != Cout:
        xs = x[:, ::stride, ::stride, :].reshape(M, Cin)
        sc = _conv_bn(xs, prep["ws"], prep["gs"], prep["bts"], M=M, Mpad=Mpad, tm=tm,
                      eps=eps, slope=slope, act=False, out_dtype=jnp.float32)
    else:
        sc = (jnp.zeros((Mpad, Np), jnp.float32)
              .at[:M, :Cout].set(x.reshape(M, Cin)))

    # --- conv2: 3x3, stride 1, pad=1 + BN, then +shortcut and final LeakyReLU (fused in pass 2)
    p2, _, _ = _im2col(h1_img, 3, 1, 1)
    out = _conv_bn(p2, prep["w2"], prep["g2"], prep["bt2"], M=M, Mpad=Mpad, tm=tm,
                   eps=eps, slope=slope, act=True, residual=sc, out_dtype=jnp.float32)

    out = out[:M, :Cout].reshape(B, Ho, Wo, Cout)
    return jnp.transpose(out, (0, 3, 1, 2))            # NHWC -> NCHW


# ----------------------------------------------------------------------------- reference
def _bn_train_ref(y_nchw, gamma, beta, eps=1e-5):
    mean = y_nchw.mean(axis=(0, 2, 3), keepdims=True)
    var = ((y_nchw - mean) ** 2).mean(axis=(0, 2, 3), keepdims=True)
    return ((y_nchw - mean) * jax.lax.rsqrt(var + eps)
            * gamma[None, :, None, None] + beta[None, :, None, None])


def _leaky_ref(z, slope=0.1):
    return jnp.where(z > 0, z, slope * z)


def resblock_ref(x_nchw, params, *, stride=1):
    dn = ("NCHW", "OIHW", "NCHW")
    conv = functools.partial(
        jax.lax.conv_general_dilated,
        dimension_numbers=dn,
        precision=jax.lax.Precision.HIGHEST,
    )
    h = conv(x_nchw, params["w1"], (stride, stride), ((1, 1), (1, 1)))
    h = h + params["b1"][None, :, None, None]
    h = _leaky_ref(_bn_train_ref(h, params["g1"], params["bt1"]))
    h = conv(h, params["w2"], (1, 1), ((1, 1), (1, 1)))
    h = h + params["b2"][None, :, None, None]
    h = _bn_train_ref(h, params["g2"], params["bt2"])
    Cin, Cout = x_nchw.shape[1], params["w1"].shape[0]
    if stride != 1 or Cin != Cout:
        s = conv(x_nchw, params["ws"], (stride, stride), ((0, 0), (0, 0)))
        s = _bn_train_ref(s, params["gs"], params["bts"])
    else:
        s = x_nchw
    return _leaky_ref(h + s)


# ----------------------------------------------------------------------------- main
if __name__ == "__main__":
    key = jax.random.PRNGKey(0)
    kx, kp = jax.random.split(key)

    # Test 1: in != out channels, stride 2 -> conv-shortcut path; block_m=64 makes M=128
    # split into 2 tiles so the tiled two-pass BN / "parallel" grid path is exercised.
    B, Cin, H, W = 2, 4, 16, 16
    Cout, stride = 8, 2
    x = jax.random.normal(kx, (B, Cin, H, W), jnp.float32)
    params = init_resblock_params(kp, Cin, Cout)
    prep = prepare_resblock_params(params)

    out = jax.block_until_ready(resblock_forward(x, prep, stride=stride, block_m=64))
    ref = jax.block_until_ready(resblock_ref(x, params, stride=stride))
    assert out.shape == ref.shape, (out.shape, ref.shape)
    # bf16 MXU operands (f32 accumulation) vs an all-f32 HIGHEST-precision reference.
    err1 = float(jnp.max(jnp.abs(out - ref)))
    assert jnp.allclose(out, ref, atol=3e-2, rtol=3e-2), err1

    # Test 2: identity shortcut (stride 1, in == out channels), M=512 over 4 tiles.
    kx2, kp2 = jax.random.split(jax.random.PRNGKey(1))
    x2 = jax.random.normal(kx2, (2, 8, 16, 16), jnp.float32)
    params2 = init_resblock_params(kp2, 8, 8)
    prep2 = prepare_resblock_params(params2)
    out2 = jax.block_until_ready(resblock_forward(x2, prep2, stride=1, block_m=128))
    ref2 = jax.block_until_ready(resblock_ref(x2, params2, stride=1))
    err2 = float(jnp.max(jnp.abs(out2 - ref2)))
    assert jnp.allclose(out2, ref2, atol=3e-2, rtol=3e-2), err2

    print("KERNEL_OK")
</pallas_src>

<mosaic_0001>
module attributes {stable_mosaic.version = 11 : i64} {
  func.func @_mm_stats_kernel(%arg0: i32, %arg1: memref<64x128xbf16, #tpu.memory_space<vmem>>, %arg2: memref<128x128xbf16, #tpu.memory_space<vmem>>, %arg3: memref<64x128xf32, #tpu.memory_space<vmem>>, %arg4: memref<8x128xf32, #tpu.memory_space<vmem>>) attributes {dimension_semantics = [#tpu.dimension_semantics<parallel>], iteration_bounds = array<i64: 2>, scalar_prefetch = 0 : i64, scratch_operands = 0 : i64, tpu.core_type = #tpu.core_type<tc>, window_params = [{transform_indices = @transform_0, window_bounds = array<i64: 64, 128>}, {pipeline_mode = #tpu.pipeline_mode<synchronous>, transform_indices = @transform_1, window_bounds = array<i64: 128, 128>}, {transform_indices = @transform_2, window_bounds = array<i64: 64, 128>}, {transform_indices = @transform_3, window_bounds = array<i64: 8, 128>}]} {
    %c0 = arith.constant 0 : index
    %c0_0 = arith.constant 0 : index
    %0 = vector.load %arg1[%c0, %c0_0] : memref<64x128xbf16, #tpu.memory_space<vmem>>, vector<64x128xbf16>
    %c0_1 = arith.constant 0 : index
    %c0_2 = arith.constant 0 : index
    %1 = vector.load %arg2[%c0_1, %c0_2] : memref<128x128xbf16, #tpu.memory_space<vmem>>, vector<128x128xbf16>
    %cst = arith.constant dense<0.000000e+00> : vector<64x128xf32>
    %2 = tpu.matmul %0, %1, %cst {dimension_numbers = #tpu.dot_dimension_numbers<[1], [0], [0], [1], [0, 0, 1, 1], [], []>} : vector<64x128xbf16>, vector<128x128xbf16>, vector<64x128xf32> -> vector<64x128xf32>
    %c0_3 = arith.constant 0 : index
    %c0_4 = arith.constant 0 : index
    %3 = vector.load %arg3[%c0_3, %c0_4] : memref<64x128xf32, #tpu.memory_space<vmem>>, vector<64x128xf32>
    tpu.vector_store %arg3[%c0_3, %c0_4], %2 {strides = array<i32>} : memref<64x128xf32, #tpu.memory_space<vmem>>, vector<64x128xf32>,
    %cst_5 = arith.constant dense<0.000000e+00> : vector<128xf32>
    %4 = vector.multi_reduction <add>, %2, %cst_5 [0] : vector<64x128xf32> to vector<128xf32>
    %5 = vector.shape_cast %4 : vector<128xf32> to vector<1x128xf32>
    %6 = arith.mulf %2, %2 : vector<64x128xf32>
    %cst_6 = arith.constant dense<0.000000e+00> : vector<128xf32>
    %7 = vector.multi_reduction <add>, %6, %cst_6 [0] : vector<64x128xf32> to vector<128xf32>
    %8 = vector.shape_cast %7 : vector<128xf32> to vector<1x128xf32>
    %cst_7 = arith.constant 0.000000e+00 : f32
    %9 = vector.broadcast %cst_7 : f32 to vector<6x128xf32>
    %10 = tpu.concatenate %5, %8, %9 in 0 : vector<1x128xf32>, vector<1x128xf32>, vector<6x128xf32> -> vector<8x128xf32>
    %c0_8 = arith.constant 0 : index
    %c0_9 = arith.constant 0 : index
    %11 = vector.load %arg4[%c0_8, %c0_9] : memref<8x128xf32, #tpu.memory_space<vmem>>, vector<8x128xf32>
    tpu.vector_store %arg4[%c0_8, %c0_9], %10 {strides = array<i32>} : memref<8x128xf32, #tpu.memory_space<vmem>>, vector<8x128xf32>,
    return
  }
  func.func @transform_0(%arg0: i32) -> (i32, i32) {
    %c0_i32 = arith.constant 0 : i32
    %c0_i32_0 = arith.constant 0 : i32
    return %arg0, %c0_i32 : i32, i32
  }
  func.func @transform_1(%arg0: i32) -> (i32, i32) {
    %c0_i32 = arith.constant 0 : i32
    %c0_i32_0 = arith.constant 0 : i32
    %c0_i32_1 = arith.constant 0 : i32
    return %c0_i32, %c0_i32_0 : i32, i32
  }
  func.func @transform_2(%arg0: i32) -> (i32, i32) {
    %c0_i32 = arith.constant 0 : i32
    %c0_i32_0 = arith.constant 0 : i32
    return %arg0, %c0_i32 : i32, i32
  }
  func.func @transform_3(%arg0: i32) -> (i32, i32) {
    %c0_i32 = arith.constant 0 : i32
    %c0_i32_0 = arith.constant 0 : i32
    return %arg0, %c0_i32 : i32, i32
  }
}

</mosaic_0001>

<bundles_post_ra>
// kernel: tpu_custom_call.1
= control target key start
LH: loop header
LB: loop body
LE: loop exit
PB: predicated region body
PF: predicated region fallthrough
CT: control target
= control target key end

     0   :  { %9 = vsyncpa [#allocation3], 0  ;;  %s1132_s0 = inlined_call_operand.hbm [shape: bf16[128,128], index: 0, kind: input, shape index: {}]   ;;  %s1133_s1 = inlined_call_operand.hbm [shape: bf16[128,128], index: 1, kind: input, shape index: {}]   ;;  %s1134_s2 = inlined_call_operand.hbm [shape: f32[128,128], index: 2, kind: output, shape index: {0}]   ;;  %s1135_s3 = inlined_call_operand.hbm [shape: f32[16,128], index: 3, kind: output, shape index: {1}]  }
   0x1   :  { %11 = vsyncpa [#allocation3 + $0x1], 0 }
   0x2   :  { %12 = vsyncpa [#allocation6], 0 }
   0x3   :  { %13 = vsyncpa [#allocation4], 0 }
   0x4   :  { %15 = vsyncpa [#allocation4 + $0x1], 0 }
   0x5   :  { %16 = vsyncpa [#allocation9], 0 }
   0x6   :  { %18 = vsyncpa [#allocation9 + $0x1], 0  ;;  %s918_s12 = smov 0   ;;  %s920_s13 = smov 0  }
   0x7   :  { %s922_s14 = smov 0   ;;  %s924_s15 = smov 0  }
   0x8 LB: > { %s939_s16 = sadd.s32 4294967295, %s888_s15   ;;  %s573_s17 = sadd.s32 4294967294, %s888_s15   ;;  %s888_s15 = sphi %s924_s15, %s1157_s15   ;;  %s884_s14 = sphi %s922_s14, %s1156_s14   ;;  %s880_s13 = sphi %s920_s13, %s1155_s13   ;;  %s876_s12 = sphi %s918_s12, %s1154_s12  }
   0x9   : > { %p44_p0 = scmp.ne.s32.totalorder %s880_s13, %s876_s12  ;;  %p1136_p1 = scmp.eq.s32.totalorder %s939_s16, 0 }
   0xa   : > { %p95_p3 = scmp.eq.s32.totalorder %s573_s17, 1  ;;  %p574_p5 = scmp.ge.s32.totalorder %s888_s15, 1 }
   0xb   : > { %p948_p4 = por %p1136_p1, %p44_p0  ;;  %p128_p7 = scmp.lt.s32.totalorder %s888_s15, 3 }
   0xc   : > { %p953_p6 = por %p95_p3, %p44_p0  ;;  %s890_s21 = smov [#allocation5]  }
   0xd   : > { %s1140_s18 = scalar_select %p948_p4, 1, 0 }
   0xe   : > { %s1141_s19 = scalar_select %p953_p6, 1, 0 }
   0xf   : > { %p958_p8 = pnand %p574_p5, %p128_p7  ;;  %s140_s22 = sshll.u32 %s890_s21, 4  ;;  %s141_s22 = int_to_ptr.vmem [resolvable:$true] %s140_s22 }
  0x10   : > { %s972_s24 = sadd.s32 1, %s888_s15   ;;  %s31_s25 = sadd.s32 1, %s884_s14 }
  0x11   : > { %s1142_s20 = scalar_select %p958_p8, 1, 0 }
  0x12   : > { %p668_p9 = pneg %p958_p8  ;;  %s28_s26 = ssub.s32 %s888_s15, %s972_s24 }
  0x13   : > { %s747_s27 = scalar_lea.vmem %s141_s22, 1024  ;;  %p755_p5 = scmp.lt.s32.totalorder %s141_s22, %s141_s22 }
  0x14   : > { %p967_p11 = pnand %p668_p9, %p1136_p1  ;;  %p748_p13 = scmp.ne.s32.totalorder %s141_s22, %s747_s27 }
  0x15   : > { %p756_p7 = scmp.lt.s32.totalorder %s747_s27, %s747_s27 }
  0x16   : > { %p738_p12 = pneg %p967_p11 }
  0x17   : > { %p757_p10 = por %p756_p7, %p755_p5 }
  0x18   : > { %p750_p0 = pnand %p748_p13, %p738_p12 }
  0x1a   : > { %p751_p3 = pneg %p750_p0 }
  0x1c   : > { %p758_p2 = pnand %p757_p10, %p751_p3 }
  0x1e   : > { %761 = shalt.err (!%p758_p2)
}
  0x1f   : > { %s891_s28 = smov 64   ;;  %s892_s29 = smov 4  }
  0x20   : > { %671 = dma.hbm_to_vmem [thread:$0]  (!%p967_p11), %s1133_s1, 1024, %s141_s22, [#allocation6], %s891_s28, %s891_s28, %s892_s29  }
  0x21   : > { %p29_p2 = scmp.eq.s32.totalorder %s28_s26, 0  ;;  %p38_p9 = scmp.ne.s32.totalorder %s884_s14, %s880_s13 }
  0x22   : > { %p39_p10 = scmp.eq.s32.totalorder %s888_s15, 0  ;;  %p684_p12 = scmp.lt.s32.totalorder %s888_s15, 2 }
  0x23   : > { %s992_s5 = scalar_select %p29_p2, %s884_s14, %s31_s25  }
  0x24   : > { %p40_p13 = por %p39_p10, %p38_p9  ;;  %p1144_p0 = scmp.eq.s32.totalorder %s939_s16, 1 }
  0x25   : > { %s154_s7 = sand.u32 1, %s884_s14   ;;  %s604_s8 = sshll.u32 %s888_s15, 9 }
  0x26   : > { %p996_p3 = por %p1144_p0, %p38_p9  ;;  %s577_s9 = sshll.u32 %s154_s7, 5 }
  0x27   : > { %s1005_s17 = scalar_lea.hbm %s1132_s0, %s604_s8  ;;  %s158_s21 = scalar_lea.vmem [#allocation2], %s577_s9 }
  0x28   : > { %s1145_s6 = scalar_select %p996_p3, 1, 0 }
  0x29   : > { %s165_s22 = sshll.u32 %s158_s21, 4  ;;  %p1007_p11 = pnand %p684_p12, %p40_p13  ;;  %s1011_s22 = int_to_ptr.vmem [resolvable:$true] %s165_s22 }
  0x2a   : > { %s1013_s25 = scalar_lea.sflag [#allocation3], %s154_s7  ;;  %s762_s26 = scalar_lea.hbm %s1005_s17, 512 }
  0x2b   : > { %p763_p5 = scmp.ne.s32.totalorder %s1005_s17, %s762_s26  ;;  %p764_p7 = pneg %p1007_p11 }
  0x2c   : > { %s767_s4 = scalar_lea.hbm %s1132_s0, 1024  ;;  %p768_p10 = scmp.lt.s32.totalorder %s1005_s17, %s1132_s0 }
  0x2d   : > { %p765_p2 = pnand %p764_p7, %p763_p5  ;;  %p769_p12 = scmp.lt.s32.totalorder %s767_s4, %s762_s26 }
  0x2f   : > { %p766_p9 = pneg %p765_p2  ;;  %p770_p13 = por %p769_p12, %p768_p10 }
  0x31   : > { %p771_p0 = pnand %p770_p13, %p766_p9 }
  0x33   : > { %774 = shalt.err (!%p771_p0)
}
  0x34   : > { %s775_s7 = scalar_lea.vmem %s1011_s22, 512  ;;  %s893_s10 = smov [#allocation2]  }
  0x35   : > { %p776_p1 = scmp.ne.s32.totalorder %s1011_s22, %s775_s7  ;;  %s780_s11 = sshll.u32 %s893_s10, 4  ;;  %s781_s11 = int_to_ptr.vmem [resolvable:$false] %s780_s11 }
  0x36   : > { %s782_s21 = scalar_lea.vmem %s781_s11, 1024  ;;  %p783_p2 = scmp.lt.s32.totalorder %s1011_s22, %s781_s11 }
  0x37   : > { %p778_p6 = pnand %p776_p1, %p764_p7  ;;  %p784_p3 = scmp.lt.s32.totalorder %s782_s21, %s775_s7 }
  0x39   : > { %p779_p5 = pneg %p778_p6  ;;  %p785_p4 = por %p784_p3, %p783_p2 }
  0x3b   : > { %p786_p8 = pnand %p785_p4, %p779_p5 }
  0x3d   : > { %789 = shalt.err (!%p786_p8)
}
  0x3e   : > { %675 = dma.hbm_to_vmem [thread:$0]  (!%p1007_p11), %s1005_s17, 512, %s1011_s22, %s1013_s25, %s891_s28, %s891_s28, %s892_s29  }
  0x3f   : > { %p1147_p1 = scmp.ne.s32.totalorder %s1142_s20, 0 }
  0x40   : > { %s1040_s26 = sand.u32 (!%p1147_p1), 1, %s880_s13   ;;  %p1148_p4 = scmp.ne.s32.totalorder (!%p1147_p1), %s1140_s18, 0 }
  0x41   : > { %177 = sbr.rel (%p1147_p1) target bundleno = 359 (0x167), region = 28  ;;  %s581_s27 = sshll.u32 (!%p1147_p1), %s1040_s26, 5 }
  0x42   : > { %s180_s30 = scalar_lea.sflag (!%p1147_p1), [#allocation3], %s1040_s26  ;;  %s1044_s4 = scalar_lea.vmem (!%p1147_p1), [#allocation2], %s581_s27 }
  0x46   : > { %859 = dma.done.wait (%p1148_p4), %s180_s30, 512  }
  0x47   : > { %861 = vsyncadd (%p1148_p4), %s180_s30, 4294966784  ;;  %p1149_p6 = scmp.eq.s32.totalorder %s939_s16, 0 }
  0x49   : > { %863 = dma.done.wait (%p1149_p6), [#allocation6], 1024   ;;  %p1150_p8 = pmov %p1149_p6 }
  0x4a   : > { %v724_v0 = vld [vmem:[#allocation5 + $0x38] sm:$0xff]   ;;  %v725_v1 = vld [vmem:[#allocation5 + $0x30] sm:$0xff]   ;;  %v726_v2 = vld [vmem:[#allocation5 + $0x28] sm:$0xff]   ;;  %s583_s18 = sshll.u32 %s1040_s26, 6  ;;  %s605_s29 = sshll.u32 %s939_s16, 10 }
  0x4b   : > { %865 = vsyncadd (%p1150_p8), [#allocation6], 4294966272  ;;  %618 = vmatprep.subr.bf16.mxu0 %v724_v0  ;;  %642 = vmatprep.subr.bf16.mxu1 %v724_v0  ;;  %v727_v3 = vld [vmem:[#allocation5 + $0x20] sm:$0xff]   ;;  %v734_v5 = vld [vmem:[%s1044_s4 + $0x10] sm:$0xff]   ;;  %s207_s20 = scalar_lea.vmem [#allocation7], %s583_s18  ;;  %s1065_s23 = scalar_lea.hbm %s1134_s2, %s605_s29 }
  0x4c   : > { %619 = vmatpush3.bf16.msra.mxu0 %v724_v0  ;;  %650 = vmatpush3.bf16.msra.mxu1 %v724_v0  ;;  %v732_v4 = vld [vmem:[%s1044_s4] sm:$0xff]   ;;  %v728_v6 = vld [vmem:[#allocation5 + $0x18] sm:$0xff]   ;;  %v729_v7 = vld [vmem:[#allocation5 + $0x10] sm:$0xff]   ;;  %s445_s28 = sshll.u32 %s207_s20, 4  ;;  %s427_s25 = scalar_lea.sflag [#allocation4], %s1040_s26  ;;  %s1060_s28 = int_to_ptr.vmem [resolvable:$true] %s445_s28 }
  0x4d   : > { %620 = vmatprep.subr.bf16.mxu0 %v725_v1  ;;  %643 = vmatprep.subr.bf16.mxu1 %v725_v1  ;;  %v730_v8 = vld [vmem:[#allocation5 + $0x8] sm:$0xff]   ;;  %v731_v9 = vld [vmem:[#allocation5] sm:$0xff]   ;;  %v735_v11 = vld [vmem:[%s1044_s4 + $0x18] sm:$0xff]   ;;  %s790_s8 = scalar_lea.vmem %s1060_s28, 1024  ;;  %p1151_p11 = scmp.ne.s32.totalorder %s1145_s6, 0 }
  0x4e   : > { %634 = vmatprep.mubr.bf16.mxu0 %v732_v4  ;;  %638 = vmatprep.mubr.bf16.mxu1 %v734_v5  ;;  %v733_v10 = vld [vmem:[%s1044_s4 + $0x8] sm:$0xff]   ;;  %p791_p3 = scmp.ne.s32.totalorder %s1060_s28, %s790_s8  ;;  %s894_s9 = smov [#allocation7]  }
  0x4f   : > { %s794_s7 = sshll.u32 %s894_s9, 4  ;;  %s795_s7 = int_to_ptr.vmem [resolvable:$false] %s794_s7 }
  0x50   : > { %621 = vmatpush3.bf16.msra.mxu0 %v725_v1  ;;  %651 = vmatpush3.bf16.msra.mxu1 %v725_v1  ;;  %p792_p7 = pnand %p791_p3, %p1151_p11  ;;  %s796_s10 = scalar_lea.vmem %s795_s7, 2048 }
  0x51   : > { %622 = vmatprep.subr.bf16.mxu0 %v726_v2  ;;  %644 = vmatprep.subr.bf16.mxu1 %v726_v2  ;;  %p797_p10 = scmp.lt.s32.totalorder %s1060_s28, %s795_s7  ;;  %p798_p12 = scmp.lt.s32.totalorder %s796_s10, %s790_s8 }
  0x52   : > { %p793_p9 = pneg %p792_p7 }
  0x53   : > { %p799_p13 = por %p798_p12, %p797_p10 }
  0x54   : > { %623 = vmatpush3.bf16.msra.mxu0 %v726_v2  ;;  %652 = vmatpush3.bf16.msra.mxu1 %v726_v2 }
  0x55   : > { %624 = vmatprep.subr.bf16.mxu0 %v727_v3  ;;  %645 = vmatprep.subr.bf16.mxu1 %v727_v3  ;;  %p800_p0 = pnand %p799_p13, %p793_p9 }
  0x58   : > { %625 = vmatpush3.bf16.msra.mxu0 %v727_v3  ;;  %653 = vmatpush3.bf16.msra.mxu1 %v727_v3 }
  0x59   : > { %626 = vmatprep.subr.bf16.mxu0 %v728_v6  ;;  %646 = vmatprep.subr.bf16.mxu1 %v728_v6 }
  0x5c   : > { %627 = vmatpush3.bf16.msra.mxu0 %v728_v6  ;;  %654 = vmatpush3.bf16.msra.mxu1 %v728_v6 }
  0x5d   : > { %628 = vmatprep.subr.bf16.mxu0 %v729_v7  ;;  %647 = vmatprep.subr.bf16.mxu1 %v729_v7 }
  0x60   : > { %629 = vmatpush3.bf16.msra.mxu0 %v729_v7  ;;  %655 = vmatpush3.bf16.msra.mxu1 %v729_v7 }
  0x61   : > { %630 = vmatprep.subr.bf16.mxu0 %v730_v8  ;;  %648 = vmatprep.subr.bf16.mxu1 %v730_v8 }
  0x64   : > { %631 = vmatpush3.bf16.msra.mxu0 %v730_v8  ;;  %656 = vmatpush3.bf16.msra.mxu1 %v730_v8 }
  0x65   : > { %632 = vmatprep.subr.bf16.mxu0 %v731_v9  ;;  %649 = vmatprep.subr.bf16.mxu1 %v731_v9 }
  0x68   : > { %633 = vmatpush3.bf16.msra.mxu0 %v731_v9  ;;  %657 = vmatpush3.bf16.msra.mxu1 %v731_v9 }
  0x6b   : > { %635 = vmatmul.mubr.bf16.vlgmr.msra.gmra.mxu0 %v733_v10  ;;  %639 = vmatmul.mubr.bf16.vlgmr.msra.gmra.mxu1 %v735_v11 }
 0x12b   : > { %v636_v12 = vpop.f32.mrf.mxu0  ;;  %v640_v13 = vpop.f32.mrf.mxu1 }
 0x12c   : > { %381 = vst [vmem:[%s207_s20 + $0x10] sm:$0xff] %v636_v12  ;;  %385 = vst [vmem:[%s207_s20 + $0x30] sm:$0xff] %v640_v13 }
 0x12d   : > { %v348_v14 = vpop.f32.mrf.mxu0  ;;  %v364_v15 = vpop.f32.mrf.mxu1 }
 0x12e   : > { %379 = vst [vmem:[%s207_s20] sm:$0xff] %v348_v14  ;;  %383 = vst [vmem:[%s207_s20 + $0x20] sm:$0xff] %v364_v15  ;;  %v400_v20 = vmul.f32 %v348_v14, %v348_v14 }
 0x12f   : > { %v637_v16 = vpop.f32.mrf.mxu0  ;;  %v641_v17 = vpop.f32.mrf.mxu1 }
 0x130   : > { %382 = vst [vmem:[%s207_s20 + $0x18] sm:$0xff] %v637_v16  ;;  %386 = vst [vmem:[%s207_s20 + $0x38] sm:$0xff] %v641_v17 }
 0x131   : > { %v351_v18 = vpop.f32.mrf.mxu0  ;;  %v367_v19 = vpop.f32.mrf.mxu1 }
 0x132   : > { %380 = vst [vmem:[%s207_s20 + $0x8] sm:$0xff] %v351_v18  ;;  %v387_v21 = vadd.f32 %v351_v18, %v348_v14  ;;  %v401_v22 = vmul.f32 %v351_v18, %v351_v18  ;;  %384 = vst [vmem:[%s207_s20 + $0x28] sm:$0xff] %v367_v19 }
 0x133   : > { %803 = shalt.err (!%p800_p0)
}
 0x134   : > { %s804_s11 = scalar_lea.hbm %s1065_s23, 1024  ;;  %s808_s30 = scalar_lea.hbm %s1134_s2, 2048 }
 0x135   : > { %p805_p5 = scmp.ne.s32.totalorder %s1065_s23, %s804_s11  ;;  %p809_p4 = scmp.lt.s32.totalorder %s1065_s23, %s1134_s2 }
 0x136   : > { %p810_p6 = scmp.lt.s32.totalorder %s808_s30, %s804_s11 }
 0x137   : > { %p806_p2 = pnand %p805_p5, %p1151_p11 }
 0x138   : > { %p811_p8 = por %p810_p6, %p809_p4 }
 0x139   : > { %p807_p1 = pneg %p806_p2 }
 0x13b   : > { %p812_p3 = pnand %p811_p8, %p807_p1 }
 0x13d   : > { %815 = shalt.err (!%p812_p3)
}
 0x13e   : > { %s895_s20 = smov 128   ;;  %s896_s29 = smov 8   ;;  %v402_v23 = vmul.f32 %v636_v12, %v636_v12  ;;  %v388_v24 = vadd.f32 %v636_v12, %v387_v21  ;;  %v408_v25 = vadd.f32 %v401_v22, %v400_v20  ;;  %v403_v26 = vmul.f32 %v637_v16, %v637_v16 }
 0x13f   : > { %664 = dma.vmem_to_hbm [thread:$0]  (%p1151_p11), %s1060_s28, 1024, %s1065_s23, %s427_s25, %s895_s20, %s895_s20, %s896_s29   ;;  %v404_v29 = vmul.f32 %v364_v15, %v364_v15  ;;  %v405_v33 = vmul.f32 %v367_v19, %v367_v19  ;;  %v406_v35 = vmul.f32 %v640_v13, %v640_v13  ;;  %v407_v38 = vmul.f32 %v641_v17, %v641_v17 }
 0x140   : > { %v409_v27 = vadd.f32 %v408_v25, %v402_v23  ;;  %v389_v28 = vadd.f32 %v637_v16, %v388_v24  ;;  %s584_s28 = sshll.u32 %s1040_s26, 3  ;;  %vm421_vm0 = vcmask 1040384   ;;  %s601_s17 = sshll.u32 %s939_s16, 7  ;;  %vm423_vm1 = vcmask 1041408  }
 0x141   : > { %s214_s22 = scalar_lea.vmem [#allocation8], %s584_s28  ;;  %s1095_s9 = scalar_lea.hbm %s1135_s3, %s601_s17 }
 0x142   : > { %v390_v30 = vadd.f32 %v389_v28, %v364_v15  ;;  %v410_v31 = vadd.f32 %v409_v27, %v403_v26  ;;  %s461_s23 = sshll.u32 %s214_s22, 4  ;;  %s432_s7 = scalar_lea.sflag [#allocation9], %s1040_s26  ;;  %s462_s23 = int_to_ptr.vmem [resolvable:$true] %s461_s23 }
 0x143   : > { %s816_s10 = scalar_lea.vmem %s462_s23, 128  ;;  %s897_s16 = smov [#allocation8]  }
 0x144   : > { %v391_v32 = vadd.f32 %v390_v30, %v367_v19  ;;  %v411_v34 = vadd.f32 %v410_v31, %v404_v29  ;;  %p817_p7 = scmp.ne.s32.totalorder %s462_s23, %s816_s10  ;;  %s820_s11 = sshll.u32 %s897_s16, 4  ;;  %s821_s11 = int_to_ptr.vmem [resolvable:$false] %s820_s11 }
 0x145   : > { %s822_s21 = scalar_lea.vmem %s821_s11, 256  ;;  %p823_p12 = scmp.lt.s32.totalorder %s462_s23, %s821_s11 }
 0x146   : > { %v392_v36 = vadd.f32 %v640_v13, %v391_v32  ;;  %v412_v37 = vadd.f32 %v411_v34, %v405_v33  ;;  %p818_p9 = pnand %p817_p7, %p1151_p11  ;;  %p824_p13 = scmp.lt.s32.totalorder %s822_s21, %s816_s10 }
 0x148   : > { %v393_v39 = vadd.f32 %v641_v17, %v392_v36  ;;  %v413_v40 = vadd.f32 %v412_v37, %v406_v35  ;;  %p819_p10 = pneg %p818_p9  ;;  %p825_p0 = por %p824_p13, %p823_p12 }
 0x14a   : > { %v394_v41 = vrot.slane %v393_v39, 4  ;;  %v414_v42 = vadd.f32 %v413_v40, %v407_v38  ;;  %p826_p5 = pnand %p825_p0, %p819_p10 }
 0x14c   : > { %v395_v43 = vadd.f32 %v394_v41, %v393_v39  ;;  %v415_v44 = vrot.slane %v414_v42, 4 }
 0x14e   : > { %v396_v45 = vrot.slane %v395_v43, 2  ;;  %v416_v46 = vadd.f32 %v415_v44, %v414_v42 }
 0x150   : > { %v397_v47 = vadd.f32 %v396_v45, %v395_v43  ;;  %v417_v48 = vrot.slane %v416_v46, 2 }
 0x152   : > { %v398_v49 = vrot.slane %v397_v47, 1  ;;  %v418_v50 = vadd.f32 %v417_v48, %v416_v46 }
 0x154   : > { %v419_v51 = vrot.slane %v418_v50, 1  ;;  %v399_v52 = vadd.f32 %v398_v49, %v397_v47 }
 0x156   : > { %v420_v53 = vadd.f32 %v419_v51, %v418_v50 }
 0x158   : > { %v422_v54 = vsel %vm421_vm0, %v399_v52, %v420_v53 }
 0x159   : > { %v424_v55 = vsel %vm423_vm1, %v422_v54, 0.0 }
 0x15a   : > { %425 = vst [vmem:[%s214_s22] sm:$0xff] %v424_v55 }
 0x15b   : > { %829 = shalt.err (!%p826_p5)
}
 0x15c   : > { %s830_s27 = scalar_lea.hbm %s1095_s9, 128  ;;  %s834_s4 = scalar_lea.hbm %s1135_s3, 256 }
 0x15d   : > { %p831_p2 = scmp.ne.s32.totalorder %s1095_s9, %s830_s27  ;;  %p835_p6 = scmp.lt.s32.totalorder %s1095_s9, %s1135_s3 }
 0x15e   : > { %p836_p8 = scmp.lt.s32.totalorder %s834_s4, %s830_s27 }
 0x15f   : > { %p832_p1 = pnand %p831_p2, %p1151_p11 }
 0x160   : > { %p837_p3 = por %p836_p8, %p835_p6 }
 0x161   : > { %p833_p4 = pneg %p832_p1 }
 0x163   : > { %p838_p7 = pnand %p837_p3, %p833_p4 }
 0x165   : > { %841 = shalt.err (!%p838_p7)
}
 0x166   : > { %665 = dma.vmem_to_hbm [thread:$0]  (%p1151_p11), %s462_s23, 128, %s1095_s9, %s432_s7  }
 0x167 PF: > { %s473_s29 = sand.u32 1, %s876_s12   ;;  %p1152_p9 = scmp.ne.s32.totalorder %s1141_s19, 0 }
 0x168   : > { %p1153_p10 = scmp.ge.s32.totalorder %s888_s15, 2  ;;  %s474_s28 = scalar_lea.sflag [#allocation4], %s473_s29 }
 0x16a   : > { %p677_p12 = pnand %p1153_p10, %p1152_p9 }
 0x16c   : > { %p678_p13 = pneg %p677_p12 }
 0x16e   : > { %867 = dma.done.wait (%p678_p13), %s474_s28, 1024  }
 0x16f   : > { %869 = vsyncadd (%p678_p13), %s474_s28, 4294966272  ;;  %s483_s17 = scalar_lea.sflag [#allocation9], %s473_s29 }
 0x170   : > { %871 = dma.done.wait (%p678_p13), %s483_s17, 128  }
 0x171   : > { %873 = vsyncadd (%p678_p13), %s483_s17, 4294967168  ;;  %p21_p11 = scmp.ge.s32.totalorder %s972_s24, 4   ;;  %s1154_s12 = smov %s880_s13 }
 0x172   : > { %s1155_s13 = smov %s884_s14  ;;  %s1156_s14 = smov %s992_s5 }
 0x173   : > { %s1157_s15 = smov %s972_s24  ;;  %23 = sbr.rel (!%p21_p11) target bundleno = 8 (0x8), region = 94 }
 0x178   :  { %488 = vsyncpa [#allocation3], 1 }
 0x179   :  { %490 = vsyncpa [#allocation3 + $0x1], 1 }
 0x17a   :  { %491 = vsyncpa [#allocation6], 1 }
 0x17b   :  { %492 = vsyncpa [#allocation4], 1 }
 0x17c   :  { %494 = vsyncpa [#allocation4 + $0x1], 1 }
 0x17d   :  { %495 = vsyncpa [#allocation9], 1 }
 0x17e   :  { %497 = vsyncpa [#allocation9 + $0x1], 1 }

</bundles_post_ra>
